<compile_context>
chip_gen: v5e
topology: v5e:2x2
jax: 0.10.0
libtpu: 0.0.40
codegen_flags: <defaults>
</compile_context>

<pallas_src>
import jax
import jax.numpy as jnp
from jax.experimental import pallas as pl
from jax.experimental.pallas import tpu as pltpu


def policy_kernel(x_ref, w1b_ref, w2_ref, b2_ref, out_ref):
    obs_n, tb = x_ref.shape            # (OBS_N, TB) -- static
    hidden = w1b_ref.shape[0]          # 128

    # ---- affine1 + ReLU on the VPU (K = obs_n is tiny; MXU would be idle) ----
    # w1b = [W1 | b1] with shape (hidden, obs_n + 1); bias column seeds h.
    h = jnp.broadcast_to(w1b_ref[:, obs_n:obs_n + 1], (hidden, tb))
    for k in range(obs_n):             # statically unrolled (obs_n == 4)
        h = h + w1b_ref[:, k:k + 1] * x_ref[k:k + 1, :]
    h = jnp.maximum(h, 0.0)            # (hidden, tb)

    # ---- affine2 on the MXU: logits^T = W2 @ h^T + b2  -> (act_n, tb) ----
    logits = jnp.dot(w2_ref[...], h, preferred_element_type=jnp.float32)
    logits = logits + b2_ref[...]

    # ---- softmax over actions (sublane axis, size act_n): pure VPU + EUP ----
    m = jnp.max(logits, axis=0, keepdims=True)
    e = jnp.exp(logits - m)
    denom = jnp.sum(e, axis=0, keepdims=True)
    out_ref[...] = (e * pl.reciprocal(denom, approx=True)).astype(out_ref.dtype)


def policy_forward(x, w1, b1, w2, b2, *, tb=128):
    """Policy forward pass.

    x : (B, obs_n) float32
    w1: (hidden, obs_n), b1: (hidden,)   -- PyTorch nn.Linear layouts
    w2: (act_n, hidden), b2: (act_n,)
    Returns (B, act_n) float32 softmax probabilities.
    """
    B, obs_n = x.shape
    hidden = w1.shape[0]
    act_n = w2.shape[0]

    # Put batch on the lane axis; pad batch to a multiple of the lane tile.
    n_blocks = pl.cdiv(B, tb)
    b_pad = n_blocks * tb
    x_t = jnp.pad(x.T, ((0, 0), (0, b_pad - B)))        # (obs_n, b_pad)
    w1b = jnp.concatenate([w1, b1[:, None]], axis=1)    # (hidden, obs_n + 1)
    b2c = b2[:, None]                                   # (act_n, 1)

    flops = 2 * b_pad * (obs_n + act_n) * hidden
    bytes_accessed = 4 * (obs_n * b_pad + hidden * (obs_n + 1)
                          + act_n * hidden + act_n + act_n * b_pad)

    out_t = pl.pallas_call(
        policy_kernel,
        out_shape=jax.ShapeDtypeStruct((act_n, b_pad), jnp.float32),
        grid=(n_blocks,),
        in_specs=[
            pl.BlockSpec((obs_n, tb), lambda i: (0, i)),            # x^T tile
            pl.BlockSpec((hidden, obs_n + 1), lambda i: (0, 0)),    # [W1|b1] resident
            pl.BlockSpec((act_n, hidden), lambda i: (0, 0)),        # W2 resident
            pl.BlockSpec((act_n, 1), lambda i: (0, 0)),             # b2 resident
        ],
        out_specs=pl.BlockSpec((act_n, tb), lambda i: (0, i)),
        compiler_params=pltpu.CompilerParams(
            dimension_semantics=("parallel",)),
        cost_estimate=pl.CostEstimate(
            flops=int(flops),
            transcendentals=int((act_n + 1) * b_pad),
            bytes_accessed=int(bytes_accessed)),
    )(x_t, w1b, w2, b2c)

    return out_t[:, :B].T                               # (B, act_n)


def reference_forward(x, w1, b1, w2, b2):
    h = jnp.maximum(x @ w1.T + b1, 0.0)
    logits = h @ w2.T + b2
    return jax.nn.softmax(logits, axis=1)


if __name__ == "__main__":
    # CartPole-like policy: observation_space_n = 4, hidden = 128,
    # action_space_n = 2.  Batch = 256 so the grid has 2 steps (exercises the
    # pipelined batch grid) while staying small.
    OBS_N, HIDDEN, ACT_N, BATCH = 4, 128, 2, 256

    key = jax.random.PRNGKey(0)
    k_x, k_w1, k_b1, k_w2, k_b2 = jax.random.split(key, 5)

    x = jax.random.normal(k_x, (BATCH, OBS_N), dtype=jnp.float32)

    # init_weights(): uniform(-0.1, 0.1); weights in PyTorch (out, in) layout.
    w1 = jax.random.uniform(k_w1, (HIDDEN, OBS_N), jnp.float32, -0.1, 0.1)
    b1 = jax.random.uniform(k_b1, (HIDDEN,), jnp.float32, -0.1, 0.1)
    w2 = jax.random.uniform(k_w2, (ACT_N, HIDDEN), jnp.float32, -0.1, 0.1)
    b2 = jax.random.uniform(k_b2, (ACT_N,), jnp.float32, -0.1, 0.1)

    out = jax.block_until_ready(policy_forward(x, w1, b1, w2, b2))
    ref = reference_forward(x, w1, b1, w2, b2)

    assert out.shape == (BATCH, ACT_N)
    # Tolerance relaxed vs exact reference because the softmax denominator
    # uses the EUP approximate reciprocal (~12-bit relative accuracy).
    assert jnp.allclose(out, ref, atol=5e-3, rtol=5e-3), "mismatch vs reference"
    assert jnp.allclose(jnp.sum(out, axis=1), 1.0, atol=5e-3), "softmax rows != 1"

    print("KERNEL_OK")
</pallas_src>

<mosaic_0001>
module attributes {stable_mosaic.version = 11 : i64} {
  func.func @policy_kernel(%arg0: i32, %arg1: memref<4x128xf32, #tpu.memory_space<vmem>>, %arg2: memref<128x5xf32, #tpu.memory_space<vmem>>, %arg3: memref<2x128xf32, #tpu.memory_space<vmem>>, %arg4: memref<2x1xf32, #tpu.memory_space<vmem>>, %arg5: memref<2x128xf32, #tpu.memory_space<vmem>>) attributes {dimension_semantics = [#tpu.dimension_semantics<parallel>], iteration_bounds = array<i64: 2>, scalar_prefetch = 0 : i64, scratch_operands = 0 : i64, tpu.core_type = #tpu.core_type<tc>, window_params = [{transform_indices = @transform_0, window_bounds = array<i64: 4, 128>}, {pipeline_mode = #tpu.pipeline_mode<synchronous>, transform_indices = @transform_1, window_bounds = array<i64: 128, 5>}, {pipeline_mode = #tpu.pipeline_mode<synchronous>, transform_indices = @transform_2, window_bounds = array<i64: 2, 128>}, {pipeline_mode = #tpu.pipeline_mode<synchronous>, transform_indices = @transform_3, window_bounds = array<i64: 2, 1>}, {transform_indices = @transform_4, window_bounds = array<i64: 2, 128>}]} {
    %c0 = arith.constant 0 : index
    %c4 = arith.constant 4 : index
    %0 = vector.load %arg2[%c0, %c4] : memref<128x5xf32, #tpu.memory_space<vmem>>, vector<128x1xf32>
    %1 = vector.shape_cast %0 : vector<128x1xf32> to vector<128x1xf32>
    %2 = vector.broadcast %1 : vector<128x1xf32> to vector<128x128xf32>
    %c0_0 = arith.constant 0 : index
    %c0_1 = arith.constant 0 : index
    %3 = vector.load %arg2[%c0_0, %c0_1] : memref<128x5xf32, #tpu.memory_space<vmem>>, vector<128x1xf32>
    %c0_2 = arith.constant 0 : index
    %c0_3 = arith.constant 0 : index
    %4 = vector.load %arg1[%c0_2, %c0_3] : memref<4x128xf32, #tpu.memory_space<vmem>>, vector<1x128xf32>
    %5 = vector.broadcast %3 : vector<128x1xf32> to vector<128x128xf32>
    %6 = vector.broadcast %4 : vector<1x128xf32> to vector<128x128xf32>
    %7 = arith.mulf %5, %6 : vector<128x128xf32>
    %8 = arith.addf %2, %7 : vector<128x128xf32>
    %c0_4 = arith.constant 0 : index
    %c1 = arith.constant 1 : index
    %9 = vector.load %arg2[%c0_4, %c1] : memref<128x5xf32, #tpu.memory_space<vmem>>, vector<128x1xf32>
    %c1_5 = arith.constant 1 : index
    %c0_6 = arith.constant 0 : index
    %10 = vector.load %arg1[%c1_5, %c0_6] : memref<4x128xf32, #tpu.memory_space<vmem>>, vector<1x128xf32>
    %11 = vector.broadcast %9 : vector<128x1xf32> to vector<128x128xf32>
    %12 = vector.broadcast %10 : vector<1x128xf32> to vector<128x128xf32>
    %13 = arith.mulf %11, %12 : vector<128x128xf32>
    %14 = arith.addf %8, %13 : vector<128x128xf32>
    %c0_7 = arith.constant 0 : index
    %c2 = arith.constant 2 : index
    %15 = vector.load %arg2[%c0_7, %c2] : memref<128x5xf32, #tpu.memory_space<vmem>>, vector<128x1xf32>
    %c2_8 = arith.constant 2 : index
    %c0_9 = arith.constant 0 : index
    %16 = vector.load %arg1[%c2_8, %c0_9] : memref<4x128xf32, #tpu.memory_space<vmem>>, vector<1x128xf32>
    %17 = vector.broadcast %15 : vector<128x1xf32> to vector<128x128xf32>
    %18 = vector.broadcast %16 : vector<1x128xf32> to vector<128x128xf32>
    %19 = arith.mulf %17, %18 : vector<128x128xf32>
    %20 = arith.addf %14, %19 : vector<128x128xf32>
    %c0_10 = arith.constant 0 : index
    %c3 = arith.constant 3 : index
    %21 = vector.load %arg2[%c0_10, %c3] : memref<128x5xf32, #tpu.memory_space<vmem>>, vector<128x1xf32>
    %c3_11 = arith.constant 3 : index
    %c0_12 = arith.constant 0 : index
    %22 = vector.load %arg1[%c3_11, %c0_12] : memref<4x128xf32, #tpu.memory_space<vmem>>, vector<1x128xf32>
    %23 = vector.broadcast %21 : vector<128x1xf32> to vector<128x128xf32>
    %24 = vector.broadcast %22 : vector<1x128xf32> to vector<128x128xf32>
    %25 = arith.mulf %23, %24 : vector<128x128xf32>
    %26 = arith.addf %20, %25 : vector<128x128xf32>
    %cst = arith.constant 0.000000e+00 : f32
    %27 = vector.broadcast %cst : f32 to vector<128x128xf32>
    %28 = arith.maximumf %26, %27 : vector<128x128xf32>
    %c0_13 = arith.constant 0 : index
    %c0_14 = arith.constant 0 : index
    %29 = vector.load %arg3[%c0_13, %c0_14] : memref<2x128xf32, #tpu.memory_space<vmem>>, vector<2x128xf32>
    %cst_15 = arith.constant dense<0.000000e+00> : vector<2x128xf32>
    %30 = tpu.matmul %29, %28, %cst_15 {dimension_numbers = #tpu.dot_dimension_numbers<[1], [0], [0], [1], [0, 0, 1, 1], [], []>} : vector<2x128xf32>, vector<128x128xf32>, vector<2x128xf32> -> vector<2x128xf32>
    %c0_16 = arith.constant 0 : index
    %c0_17 = arith.constant 0 : index
    %31 = vector.load %arg4[%c0_16, %c0_17] : memref<2x1xf32, #tpu.memory_space<vmem>>, vector<2x1xf32>
    %32 = vector.broadcast %31 : vector<2x1xf32> to vector<2x128xf32>
    %33 = arith.addf %30, %32 : vector<2x128xf32>
    %cst_18 = arith.constant dense<0xFF800000> : vector<128xf32>
    %34 = vector.multi_reduction <maximumf>, %33, %cst_18 [0] : vector<2x128xf32> to vector<128xf32>
    %35 = vector.shape_cast %34 : vector<128xf32> to vector<1x128xf32>
    %36 = vector.broadcast %35 : vector<1x128xf32> to vector<2x128xf32>
    %37 = arith.subf %33, %36 : vector<2x128xf32>
    %38 = math.exp %37 : vector<2x128xf32>
    %cst_19 = arith.constant dense<0.000000e+00> : vector<128xf32>
    %39 = vector.multi_reduction <add>, %38, %cst_19 [0] : vector<2x128xf32> to vector<128xf32>
    %40 = vector.shape_cast %39 : vector<128xf32> to vector<1x128xf32>
    %41 = tpu.reciprocal %40 {approx = true} : vector<1x128xf32> -> vector<1x128xf32>
    %42 = vector.broadcast %41 : vector<1x128xf32> to vector<2x128xf32>
    %43 = arith.mulf %38, %42 : vector<2x128xf32>
    %c0_20 = arith.constant 0 : index
    %c0_21 = arith.constant 0 : index
    %44 = vector.load %arg5[%c0_20, %c0_21] : memref<2x128xf32, #tpu.memory_space<vmem>>, vector<2x128xf32>
    tpu.vector_store %arg5[%c0_20, %c0_21], %43 {strides = array<i32>} : memref<2x128xf32, #tpu.memory_space<vmem>>, vector<2x128xf32>,
    return
  }
  func.func @transform_0(%arg0: i32) -> (i32, i32) {
    %c0_i32 = arith.constant 0 : i32
    %c0_i32_0 = arith.constant 0 : i32
    return %c0_i32, %arg0 : i32, i32
  }
  func.func @transform_1(%arg0: i32) -> (i32, i32) {
    %c0_i32 = arith.constant 0 : i32
    %c0_i32_0 = arith.constant 0 : i32
    %c0_i32_1 = arith.constant 0 : i32
    return %c0_i32, %c0_i32_0 : i32, i32
  }
  func.func @transform_2(%arg0: i32) -> (i32, i32) {
    %c0_i32 = arith.constant 0 : i32
    %c0_i32_0 = arith.constant 0 : i32
    %c0_i32_1 = arith.constant 0 : i32
    return %c0_i32, %c0_i32_0 : i32, i32
  }
  func.func @transform_3(%arg0: i32) -> (i32, i32) {
    %c0_i32 = arith.constant 0 : i32
    %c0_i32_0 = arith.constant 0 : i32
    %c0_i32_1 = arith.constant 0 : i32
    return %c0_i32, %c0_i32_0 : i32, i32
  }
  func.func @transform_4(%arg0: i32) -> (i32, i32) {
    %c0_i32 = arith.constant 0 : i32
    %c0_i32_0 = arith.constant 0 : i32
    return %c0_i32, %arg0 : i32, i32
  }
}

</mosaic_0001>

<bundles_post_ra>
// kernel: tpu_custom_call.1
= control target key start
LH: loop header
LB: loop body
LE: loop exit
PB: predicated region body
PF: predicated region fallthrough
CT: control target
= control target key end

     0   :  { %9 = vsyncpa [#allocation3], 0  ;;  %s1436_s0 = inlined_call_operand.vmem [shape: f32[4,256], index: 0, kind: input, shape index: {}]   ;;  %s1437_s1 = inlined_call_operand.vmem [shape: f32[128,5], index: 1, kind: input, shape index: {}]   ;;  %s1438_s2 = inlined_call_operand.vmem [shape: f32[2,128], index: 2, kind: input, shape index: {}]   ;;  %s1439_s3 = inlined_call_operand.vmem [shape: f32[2,1], index: 3, kind: input, shape index: {}]   ;;  %s1440_s4 = inlined_call_operand.hbm [shape: f32[2,256], index: 4, kind: output, shape index: {}]  }
   0x1   :  { %11 = vsyncpa [#allocation3 + $0x1], 0  ;;  %s1009_s15 = smov 0   ;;  %s1011_s16 = smov 0  }
   0x2   :  { %s1013_s17 = smov 0   ;;  %s1015_s18 = smov 0  }
   0x3 LB: > { %s1030_s19 = sadd.s32 4294967295, %s977_s18   ;;  %s820_s20 = sadd.s32 4294967294, %s977_s18   ;;  %s977_s18 = sphi %s1015_s18, %s1446_s18   ;;  %s973_s17 = sphi %s1013_s17, %s1445_s17   ;;  %s969_s16 = sphi %s1011_s16, %s1444_s16   ;;  %s965_s15 = sphi %s1009_s15, %s1443_s15  }
   0x4   : > { %s1034_s21 = sadd.s32 1, %s977_s18   ;;  %s113_s22 = sadd.s32 1, %s973_s17 }
   0x5   : > { %s110_s23 = ssub.s32 %s977_s18, %s1034_s21  ;;  %p123_p0 = scmp.ne.s32.totalorder %s973_s17, %s969_s16 }
   0x6   : > { %p111_p1 = scmp.eq.s32.totalorder %s110_s23, 0  ;;  %p124_p2 = scmp.eq.s32.totalorder %s1030_s19, 1 }
   0x7   : > { %p129_p3 = scmp.ne.s32.totalorder %s969_s16, %s965_s15  ;;  %p130_p4 = scmp.eq.s32.totalorder %s820_s20, 1 }
   0x8   : > { %s1045_s24 = scalar_select %p111_p1, %s973_s17, %s113_s22  }
   0x9   : > { %p1047_p5 = por %p124_p2, %p123_p0  ;;  %p1051_p6 = por %p130_p4, %p129_p3 }
   0xa   : > { %p823_p7 = scmp.ge.s32.totalorder %s977_s18, 1  ;;  %p164_p8 = scmp.lt.s32.totalorder %s977_s18, 3 }
   0xc   : > { %p165_p9 = pnand %p823_p7, %p164_p8 }
   0xd   : > { %p189_p10 = scmp.lt.s32.totalorder (!%p165_p9), %s1030_s19, 1  ;;  %s186_s8 = sand.u32 (!%p165_p9), 1, %s969_s16  }
   0xe   : > { %168 = sbr.rel (%p165_p9) target bundleno = 566 (0x236), region = 36  ;;  %s824_s9 = sshll.u32 (!%p165_p9), %s186_s8, 1 }
   0xf   : > { %s827_s10 = sshll.u32 (!%p165_p9), %s1030_s19, 1  ;;  %s746_s27 = scalar_lea.sflag (!%p165_p9), [#allocation3], %s186_s8 }
  0x13   : > { %v1060_v0 = vld [vmem:[%s1437_s1 + $0x20] sm:$0xff]  ;;  %v1065_v1 = vld [vmem:[%s1437_s1 + $0x10] sm:$0xff]  ;;  %v979_v3 = vmov 4   ;;  %v1079_v4 = vld [vmem:[%s1437_s1 + $0x28] sm:$0xff]  ;;  %s190_s13 = scalar_select %p189_p10, %s1030_s19, 1  ;;  %v980_v17 = vmov 0  }
  0x14   : > { %v1070_v2 = vld [vmem:[%s1437_s1] sm:$0xff]  ;;  %876 = vset.pattern.permute.xlu2 %v979_v3  ;;  %875 = vset.pattern.permute.xlu1 %v979_v3  ;;  %v1084_v5 = vld [vmem:[%s1437_s1 + $0x18] sm:$0xff]  ;;  %v1089_v6 = vld [vmem:[%s1437_s1 + $0x8] sm:$0xff]  ;;  %v981_v18 = vmov 1   ;;  %v982_v24 = vmov 2   ;;  %v983_v26 = vmov 3  }
  0x15   : > { %874 = vset.pattern.permute.xlu0 %v979_v3  ;;  %231 = vperm.xlu2 %876, %v1060_v0   ;;  %s825_s14 = sshll.u32 %s190_s13, 2  ;;  %v1103_v7 = vld [vmem:[%s1437_s1 + $0x40] sm:$0xff]  ;;  %v1108_v8 = vld [vmem:[%s1437_s1 + $0x38] sm:$0xff]  ;;  %v1113_v9 = vld [vmem:[%s1437_s1 + $0x30] sm:$0xff]  ;;  %vm724_vm0 = vcmask 1041408   ;;  %s756_s13 = scalar_lea.hbm %s1440_s4, %s827_s10 }
  0x16   : > { %221 = vperm.xlu1 %875, %v1065_v1   ;;  %211 = vperm.xlu0 %874, %v1070_v2   ;;  %s1098_s23 = scalar_lea.vmem %s1436_s0, %s825_s14  ;;  %v1121_v10 = vld [vmem:[%s1437_s1 + $0x58] sm:$0xff]  ;;  %v1126_v11 = vld [vmem:[%s1437_s1 + $0x50] sm:$0xff]  ;;  %v1131_v12 = vld [vmem:[%s1437_s1 + $0x48] sm:$0xff]  ;;  %s188_s14 = scalar_lea.vmem [#allocation2], %s824_s9 }
  0x17   : > { %v1139_v13 = vld [vmem:[%s1437_s1 + $0x70] sm:$0xff]  ;;  %v1144_v14 = vld [vmem:[%s1437_s1 + $0x68] sm:$0xff]  ;;  %v1149_v15 = vld [vmem:[%s1437_s1 + $0x60] sm:$0xff]  ;;  %s758_s20 = sshll.u32 %s188_s14, 4  ;;  %s760_s22 = sshll.u32 %s756_s13, 4  ;;  %s759_s20 = int_to_ptr.vmem [resolvable:$true] %s758_s20  ;;  %s761_s22 = int_to_ptr.hbm [resolvable:$true] %s760_s22 }
  0x18   : > { %v208_v16 = vld [vmem:[%s1437_s1 + $0x78] sm:$0xff]  ;;  %v1206_v31 = vld [vmem:[%s1098_s23] ss:$0 sm:$0xff]  ;;  %s929_s28 = sshra.s32 %s761_s22, 4  ;;  %s930_s28 = int_to_ptr.hbm [resolvable:$true] %s929_s28 }
  0x19   : > { %s931_s29 = scalar_lea.hbm %s930_s28, 2  ;;  %p936_p0 = scmp.lt.s32.totalorder %s930_s28, %s1440_s4 }
  0x1a   : > { %p932_p11 = scmp.ne.s32.totalorder %s930_s28, %s931_s29 }
  0x1c   : > { %p933_p12 = pnand %p932_p11, %p1047_p5 }
  0x1d   : > { %236 = vperm.xlu2 %876, %v1079_v4  }
  0x1e   : > { %226 = vperm.xlu1 %875, %v1084_v5   ;;  %216 = vperm.xlu0 %874, %v1089_v6   ;;  %p934_p13 = pneg %p933_p12 }
  0x25   : > { %251 = vperm.xlu2 %876, %v1103_v7  }
  0x26   : > { %246 = vperm.xlu1 %875, %v1108_v8   ;;  %241 = vperm.xlu0 %874, %v1113_v9  }
  0x2d   : > { %266 = vperm.xlu2 %876, %v1121_v10  }
  0x2e   : > { %261 = vperm.xlu1 %875, %v1126_v11   ;;  %256 = vperm.xlu0 %874, %v1131_v12  }
  0x35   : > { %281 = vperm.xlu2 %876, %v1139_v13  }
  0x36   : > { %276 = vperm.xlu1 %875, %v1144_v14   ;;  %271 = vperm.xlu0 %874, %v1149_v15  }
  0x3d   : > { %878 = vset.pattern.permute.xlu2 %v980_v17 }
  0x3e   : > { %877 = vset.pattern.permute.xlu1 %v980_v17  ;;  %286 = vperm.xlu0 %874, %v208_v16  }
  0x3f   : > { %295 = vperm.xlu2 %878, %v1089_v6   ;;  %291 = vperm.xlu1 %877, %v1070_v2  }
  0x46   : > { %879 = vset.pattern.permute.xlu0 %v980_v17 }
  0x47   : > { %307 = vperm.xlu2 %878, %v1060_v0   ;;  %303 = vperm.xlu1 %877, %v1084_v5  }
  0x48   : > { %299 = vperm.xlu0 %879, %v1065_v1  }
  0x4f   : > { %315 = vperm.xlu2 %878, %v1113_v9   ;;  %311 = vperm.xlu1 %877, %v1079_v4  }
  0x50   : > { %319 = vperm.xlu0 %879, %v1108_v8  }
  0x57   : > { %327 = vperm.xlu2 %878, %v1131_v12   ;;  %323 = vperm.xlu1 %877, %v1103_v7  }
  0x58   : > { %331 = vperm.xlu0 %879, %v1126_v11  }
  0x5f   : > { %339 = vperm.xlu2 %878, %v1149_v15   ;;  %335 = vperm.xlu1 %877, %v1121_v10  }
  0x60   : > { %343 = vperm.xlu0 %879, %v1144_v14  }
  0x67   : > { %351 = vperm.xlu2 %878, %v208_v16   ;;  %347 = vperm.xlu1 %877, %v1139_v13  }
  0x68   : > { %880 = vset.pattern.permute.xlu0 %v981_v18 }
  0x69   : > { %389 = vperm.xlu0 %880, %v1070_v2  }
  0x6f   : > { %882 = vset.pattern.permute.xlu2 %v981_v18  ;;  %881 = vset.pattern.permute.xlu1 %v981_v18  ;;  %v232_v19 = vpop.permute.xlu2 %231 }
  0x70   : > { %397 = vperm.xlu2 %882, %v1065_v1   ;;  %393 = vperm.xlu1 %881, %v1089_v6  }
  0x71   : > { %409 = vperm.xlu0 %880, %v1079_v4  }
  0x77   : > { %v1182_v20 = vpop.permute.xlu2 %236 }
  0x78   : > { %405 = vperm.xlu2 %882, %v1060_v0   ;;  %401 = vperm.xlu1 %881, %v1084_v5  }
  0x79   : > { %445 = vperm.xlu0 %880, %v1139_v13  }
  0x7f   : > { %v1187_v21 = vpop.permute.xlu2 %251 }
  0x80   : > { %449 = vperm.xlu2 %882, %v208_v16   ;;  %413 = vperm.xlu1 %881, %v1113_v9  }
  0x81   : > { %433 = vperm.xlu0 %880, %v1121_v10  }
  0x87   : > { %v1191_v22 = vpop.permute.xlu2 %266 }
  0x88   : > { %v1193_v23 = vpop.permute.xlu1 %221  ;;  %441 = vperm.xlu2 %882, %v1144_v14   ;;  %883 = vset.pattern.permute.xlu1 %v982_v24  ;;  %v212_v25 = vpop.permute.xlu0 %211 }
  0x89   : > { %889 = vset.pattern.permute.xlu0 %v983_v26  ;;  %547 = vperm.xlu1 %883, %v208_v16  }
  0x8a   : > { %633 = vperm.xlu0 %889, %v1149_v15  }
  0x8f   : > { %v1199_v27 = vpop.permute.xlu2 %281 }
  0x90   : > { %v227_v28 = vpop.permute.xlu1 %226  ;;  %437 = vperm.xlu2 %882, %v1149_v15   ;;  %v217_v29 = vpop.permute.xlu0 %216 }
  0x91   : > { %884 = vset.pattern.permute.xlu1 %v983_v26 }
  0x92   : > { %613 = vperm.xlu0 %889, %v1108_v8   ;;  %645 = vperm.xlu1 %884, %v208_v16   ;;  %v1263_v16 = vld [vmem:[%s1098_s23 + $0x1] ss:$0 sm:$0xff] }
  0x98   : > { %v247_v30 = vpop.permute.xlu1 %246  ;;  %886 = vset.pattern.permute.xlu2 %v983_v26  ;;  %v242_v32 = vpop.permute.xlu0 %241 }
  0x99   : > { %641 = vperm.xlu2 %886, %v1139_v13   ;;  %v296_v33 = vpop.permute.xlu2 %295 }
  0x9a   : > { %v356_v34 = vmul.f32 %v1206_v31, %v296_v33  ;;  %896 = vset.pattern.permute.xlu0 %v982_v24  ;;  %885 = vset.pattern.permute.xlu1 %v982_v24 }
  0x9b   : > { %543 = vperm.xlu0 %896, %v1139_v13   ;;  %539 = vperm.xlu1 %885, %v1144_v14  }
  0x9c   : > { %v1214_v35 = vadd.f32 %v356_v34, %v217_v29 }
  0xa0   : > { %v262_v36 = vpop.permute.xlu1 %261  ;;  %v257_v37 = vpop.permute.xlu0 %256 }
  0xa1   : > { %637 = vperm.xlu2 %886, %v1144_v14   ;;  %v308_v38 = vpop.permute.xlu2 %307 }
  0xa2   : > { %v359_v39 = vmul.f32 %v1206_v31, %v308_v38 }
  0xa3   : > { %523 = vperm.xlu0 %896, %v1131_v12   ;;  %535 = vperm.xlu1 %885, %v1149_v15  }
  0xa4   : > { %v1220_v40 = vadd.f32 %v359_v39, %v232_v19 }
  0xa8   : > { %v1222_v41 = vpop.permute.xlu1 %276  ;;  %v272_v42 = vpop.permute.xlu0 %271 }
  0xa9   : > { %888 = vset.pattern.permute.xlu2 %v982_v24  ;;  %v316_v43 = vpop.permute.xlu2 %315 }
  0xaa   : > { %v361_v44 = vmul.f32 %v1206_v31, %v316_v43  ;;  %531 = vperm.xlu2 %888, %v1121_v10  }
  0xab   : > { %515 = vperm.xlu0 %896, %v1108_v8   ;;  %887 = vset.pattern.permute.xlu1 %v981_v18 }
  0xac   : > { %v1229_v45 = vadd.f32 %v361_v44, %v242_v32  ;;  %429 = vperm.xlu1 %887, %v1126_v11  }
  0xb0   : > { %v1232_v46 = vpop.permute.xlu0 %286 }
  0xb1   : > { %v328_v47 = vpop.permute.xlu2 %327  ;;  %v292_v48 = vpop.permute.xlu1 %291 }
  0xb2   : > { %v364_v49 = vmul.f32 %v1206_v31, %v328_v47  ;;  %v355_v50 = vmul.f32 %v1206_v31, %v292_v48  ;;  %527 = vperm.xlu2 %888, %v1126_v11  }
  0xb3   : > { %499 = vperm.xlu0 %896, %v1084_v5  }
  0xb4   : > { %v1238_v51 = vadd.f32 %v364_v49, %v257_v37  ;;  %v371_v52 = vadd.f32 %v355_v50, %v212_v25  ;;  %425 = vperm.xlu1 %887, %v1131_v12  }
  0xb9   : > { %v340_v53 = vpop.permute.xlu2 %339  ;;  %v304_v54 = vpop.permute.xlu1 %303 }
  0xba   : > { %v367_v55 = vmul.f32 %v1206_v31, %v340_v53  ;;  %v358_v56 = vmul.f32 %v1206_v31, %v304_v54  ;;  %v300_v57 = vpop.permute.xlu0 %299  ;;  %891 = vset.pattern.permute.xlu2 %v981_v18 }
  0xbb   : > { %v357_v58 = vmul.f32 %v1206_v31, %v300_v57  ;;  %421 = vperm.xlu2 %891, %v1103_v7   ;;  %901 = vset.pattern.permute.xlu0 %v983_v26 }
  0xbc   : > { %v1247_v59 = vadd.f32 %v367_v55, %v272_v42  ;;  %v374_v60 = vadd.f32 %v358_v56, %v227_v28  ;;  %890 = vset.pattern.permute.xlu1 %v983_v26  ;;  %593 = vperm.xlu0 %901, %v1065_v1  }
  0xbd   : > { %v373_v61 = vadd.f32 %v357_v58, %v1193_v23  ;;  %629 = vperm.xlu1 %890, %v1121_v10  }
  0xc1   : > { %v1253_v62 = vpop.permute.xlu2 %351  ;;  %v312_v63 = vpop.permute.xlu1 %311 }
  0xc2   : > { %v360_v3 = vmul.f32 %v1206_v31, %v312_v63  ;;  %v320_v13 = vpop.permute.xlu0 %319  ;;  %v1330_v63 = vld [vmem:[%s1098_s23 + $0x3] ss:$0 sm:$0xff] }
  0xc3   : > { %v362_v14 = vmul.f32 %v1206_v31, %v320_v13  ;;  %417 = vperm.xlu2 %891, %v1108_v8  }
  0xc4   : > { %906 = vset.pattern.permute.xlu0 %v980_v17  ;;  %v376_v44 = vadd.f32 %v360_v3, %v1182_v20 }
  0xc5   : > { %v1259_v15 = vadd.f32 %v362_v14, %v247_v30  ;;  %625 = vperm.xlu1 %890, %v1126_v11  }
  0xc9   : > { %v324_v18 = vpop.permute.xlu1 %323 }
  0xca   : > { %v1266_v10 = vmul.f32 %v1206_v31, %v324_v18  ;;  %v332_v19 = vpop.permute.xlu0 %331  ;;  %v398_v23 = vpop.permute.xlu2 %397 }
  0xcb   : > { %v365_v25 = vmul.f32 %v1206_v31, %v332_v19  ;;  %v455_v28 = vmul.f32 %v1263_v16, %v398_v23  ;;  %893 = vset.pattern.permute.xlu2 %v983_v26 }
  0xcc   : > { %621 = vperm.xlu2 %893, %v1131_v12  }
  0xcd   : > { %v1272_v8 = vadd.f32 %v365_v25, %v262_v36  ;;  %v1274_v29 = vadd.f32 %v455_v28, %v373_v61  ;;  %892 = vset.pattern.permute.xlu1 %v982_v24 }
  0xce   : > { %519 = vperm.xlu1 %892, %v1103_v7  }
  0xd1   : > { %v1278_v11 = vpop.permute.xlu1 %335 }
  0xd2   : > { %v344_v30 = vpop.permute.xlu0 %343  ;;  %v406_v32 = vpop.permute.xlu2 %405 }
  0xd3   : > { %v457_v33 = vmul.f32 %v1263_v16, %v406_v32  ;;  %v368_v23 = vmul.f32 %v1206_v31, %v344_v30 }
  0xd4   : > { %895 = vset.pattern.permute.xlu2 %v982_v24 }
  0xd5   : > { %v1283_v34 = vadd.f32 %v457_v33, %v1220_v40  ;;  %511 = vperm.xlu2 %895, %v1113_v9   ;;  %v384_v32 = vadd.f32 %v368_v23, %v1222_v41  ;;  %v366_v23 = vmul.f32 %v1206_v31, %v1278_v11 }
  0xd6   : > { %894 = vset.pattern.permute.xlu1 %v983_v26 }
  0xd7   : > { %617 = vperm.xlu1 %894, %v1103_v7  }
  0xd9   : > { %v348_v12 = vpop.permute.xlu1 %347 }
  0xda   : > { %v450_v36 = vpop.permute.xlu2 %449 }
  0xdb   : > { %v390_v37 = vpop.permute.xlu0 %389  ;;  %v468_v61 = vmul.f32 %v1263_v16, %v450_v36 }
  0xdc   : > { %v453_v38 = vmul.f32 %v1263_v16, %v390_v37 }
  0xdd   : > { %898 = vset.pattern.permute.xlu2 %v983_v26 }
  0xde   : > { %v1290_v39 = vadd.f32 %v453_v38, %v371_v52  ;;  %609 = vperm.xlu2 %898, %v1113_v9  }
  0xdf   : > { %897 = vset.pattern.permute.xlu1 %v982_v24 }
  0xe0   : > { %507 = vperm.xlu1 %897, %v1079_v4  }
  0xe2   : > { %v442_v40 = vpop.permute.xlu2 %441  ;;  %v394_v42 = vpop.permute.xlu1 %393 }
  0xe3   : > { %v454_v43 = vmul.f32 %v1263_v16, %v394_v42  ;;  %v410_v7 = vpop.permute.xlu0 %409  ;;  %v466_v25 = vmul.f32 %v1263_v16, %v442_v40 }
  0xe4   : > { %v458_v47 = vmul.f32 %v1263_v16, %v410_v7 }
  0xe5   : > { %v1299_v48 = vadd.f32 %v454_v43, %v1214_v35  ;;  %v482_v36 = vadd.f32 %v466_v25, %v384_v32 }
  0xe6   : > { %v1301_v49 = vadd.f32 %v458_v47, %v376_v44  ;;  %605 = vperm.xlu2 %898, %v1079_v4  }
  0xe8   : > { %503 = vperm.xlu1 %897, %v1060_v0  }
  0xea   : > { %v402_v9 = vpop.permute.xlu1 %401  ;;  %v438_v50 = vpop.permute.xlu2 %437 }
  0xeb   : > { %v456_v52 = vmul.f32 %v1263_v16, %v402_v9  ;;  %v446_v53 = vpop.permute.xlu0 %445 }
  0xed   : > { %v1306_v54 = vadd.f32 %v456_v52, %v374_v60  ;;  %v1323_v60 = vld [vmem:[%s1098_s23 + $0x2] ss:$0 sm:$0xff]  ;;  %s935_s23 = scalar_lea.hbm %s1440_s4, 4 }
  0xee   : > { %900 = vset.pattern.permute.xlu2 %v982_v24  ;;  %p937_p1 = scmp.lt.s32.totalorder %s935_s23, %s931_s29 }
  0xef   : > { %495 = vperm.xlu2 %900, %v1065_v1  }
  0xf0   : > { %899 = vset.pattern.permute.xlu1 %v983_v26  ;;  %p938_p2 = por %p937_p1, %p936_p0 }
  0xf1   : > { %601 = vperm.xlu1 %899, %v1060_v0   ;;  %v370_v0 = vmul.f32 %v1206_v31, %v1253_v62 }
  0xf2   : > { %v414_v20 = vpop.permute.xlu1 %413  ;;  %p939_p3 = pnand %p938_p2, %p934_p13 }
  0xf3   : > { %v459_v4 = vmul.f32 %v1263_v16, %v414_v20  ;;  %v642_v35 = vpop.permute.xlu2 %641  ;;  %v1313_v55 = vpop.permute.xlu0 %433 }
  0xf5   : > { %v1316_v56 = vadd.f32 %v459_v4, %v1229_v45  ;;  %v386_v45 = vadd.f32 %v370_v0, %v1232_v46 }
  0xf7   : > { %491 = vperm.xlu2 %900, %v1089_v6   ;;  %v484_v3 = vadd.f32 %v468_v61, %v386_v45 }
  0xf9   : > { %597 = vperm.xlu1 %899, %v1084_v5  }
  0xfb   : > { %v548_v57 = vpop.permute.xlu1 %547  ;;  %v638_v1 = vpop.permute.xlu2 %637 }
  0xfc   : > { %v634_v58 = vpop.permute.xlu0 %633  ;;  %v566_v5 = vmul.f32 %v1323_v60, %v548_v57  ;;  %v662_v40 = vmul.f32 %v1330_v63, %v638_v1 }
  0xfd   : > { %v661_v4 = vmul.f32 %v1330_v63, %v634_v58 }
  0xfe   : > { %v582_v19 = vadd.f32 %v566_v5, %v484_v3 }
  0xff   : > { %903 = vset.pattern.permute.xlu2 %v983_v26 }
 0x100   : > { %589 = vperm.xlu2 %903, %v1089_v6   ;;  %v369_v6 = vmul.f32 %v1206_v31, %v348_v12 }
 0x101   : > { %902 = vset.pattern.permute.xlu1 %v982_v24  ;;  %v467_v24 = vmul.f32 %v1263_v16, %v446_v53 }
 0x102   : > { %487 = vperm.xlu1 %902, %v1070_v2   ;;  %v385_v33 = vadd.f32 %v369_v6, %v1199_v27  ;;  %v464_v6 = vmul.f32 %v1263_v16, %v1313_v55 }
 0x104   : > { %v532_v62 = vpop.permute.xlu2 %531  ;;  %v646_v13 = vpop.permute.xlu1 %645  ;;  %v483_v12 = vadd.f32 %v467_v24, %v385_v33 }
 0x105   : > { %v664_v14 = vmul.f32 %v1330_v63, %v646_v13  ;;  %v614_v18 = vpop.permute.xlu0 %613  ;;  %v562_v25 = vmul.f32 %v1323_v60, %v532_v62 }
 0x106   : > { %v656_v13 = vmul.f32 %v1330_v63, %v614_v18 }
 0x107   : > { %v680_v46 = vadd.f32 %v664_v14, %v582_v19 }
 0x108   : > { %905 = vset.pattern.permute.xlu2 %v980_v17  ;;  %v663_v17 = vmul.f32 %v1330_v63, %v642_v35 }
 0x109   : > { %v696_v28 = vmax.f32 %v680_v46, 0.0  ;;  %v382_v46 = vadd.f32 %v366_v23, %v1191_v22 }
 0x10a   : > { %904 = vset.pattern.permute.xlu1 %v983_v26 }
 0x10b   : > { %585 = vperm.xlu1 %904, %v1070_v2   ;;  %704 = vmatpush.msra.mxu0 %v696_v28  ;;  %v465_v2 = vmul.f32 %v1263_v16, %v438_v50  ;;  %v480_v28 = vadd.f32 %v464_v6, %v382_v46 }
 0x10c   : > { %v528_v30 = vpop.permute.xlu2 %527 }
 0x10d   : > { %v544_v37 = vpop.permute.xlu0 %543  ;;  %v540_v38 = vpop.permute.xlu1 %539  ;;  %v481_v20 = vadd.f32 %v465_v2, %v1247_v59  ;;  %v578_v33 = vadd.f32 %v562_v25, %v480_v28  ;;  %v561_v55 = vmul.f32 %v1323_v60, %v528_v30  ;;  %v379_v2 = vadd.f32 %v1266_v10, %v1187_v21  ;;  %v698_v25 = vld [vmem:[%s1439_s3] sm:$0x3] }
 0x10e   : > { %v565_v42 = vmul.f32 %v1323_v60, %v544_v37  ;;  %v564_v26 = vmul.f32 %v1323_v60, %v540_v38  ;;  %701 = vperm.xlu2 %905, %v698_v25  }
 0x110   : > { %v581_v43 = vadd.f32 %v565_v42, %v483_v12  ;;  %v580_v41 = vadd.f32 %v564_v26, %v482_v36 }
 0x112   : > { %v679_v7 = vadd.f32 %v663_v17, %v581_v43  ;;  %v678_v27 = vadd.f32 %v662_v40, %v580_v41 }
 0x114   : > { %v695_v44 = vmax.f32 %v679_v7, 0.0  ;;  %v694_v47 = vmax.f32 %v678_v27, 0.0 }
 0x115   : > { %v524_v9 = vpop.permute.xlu0 %523  ;;  %v422_v52 = vpop.permute.xlu2 %421 }
 0x116   : > { %v536_v53 = vpop.permute.xlu1 %535  ;;  %705 = vmatpush.msra.mxu0 %v695_v44  ;;  %v560_v12 = vmul.f32 %v1323_v60, %v524_v9 }
 0x117   : > { %v563_v35 = vmul.f32 %v1323_v60, %v536_v53 }
 0x118   : > { %706 = vmatpush.msra.mxu0 %v694_v47 }
 0x119   : > { %v579_v57 = vadd.f32 %v563_v35, %v481_v20 }
 0x11b   : > { %v677_v1 = vadd.f32 %v661_v4, %v579_v57 }
 0x11d   : > { %v516_v0 = vpop.permute.xlu0 %515  ;;  %v418_v61 = vpop.permute.xlu2 %417  ;;  %v693_v45 = vmax.f32 %v677_v1, 0.0 }
 0x11e   : > { %v558_v50 = vmul.f32 %v1323_v60, %v516_v0  ;;  %v460_v5 = vmul.f32 %v1263_v16, %v418_v61  ;;  %v430_v3 = vpop.permute.xlu1 %429 }
 0x11f   : > { %707 = vmatpush.msra.mxu0 %v693_v45 }
 0x120   : > { %v476_v59 = vadd.f32 %v460_v5, %v1259_v15  ;;  %v463_v15 = vmul.f32 %v1263_v16, %v430_v3 }
 0x122   : > { %v574_v14 = vadd.f32 %v558_v50, %v476_v59  ;;  %v479_v22 = vadd.f32 %v463_v15, %v1272_v8  ;;  %v461_v8 = vmul.f32 %v1263_v16, %v422_v52 }
 0x124   : > { %v672_v58 = vadd.f32 %v656_v13, %v574_v14  ;;  %v577_v26 = vadd.f32 %v561_v55, %v479_v22  ;;  %v477_v47 = vadd.f32 %v461_v8, %v379_v2 }
 0x126   : > { %v426_v19 = vpop.permute.xlu1 %425  ;;  %v622_v24 = vpop.permute.xlu2 %621  ;;  %v688_v52 = vmax.f32 %v672_v58, 0.0 }
 0x127   : > { %v462_v32 = vmul.f32 %v1263_v16, %v426_v19  ;;  %v658_v37 = vmul.f32 %v1330_v63, %v622_v24 }
 0x129   : > { %v478_v31 = vadd.f32 %v462_v32, %v1238_v51 }
 0x12b   : > { %v576_v38 = vadd.f32 %v560_v12, %v478_v31 }
 0x12d   : > { %v674_v41 = vadd.f32 %v658_v37, %v576_v38 }
 0x12f   : > { %v630_v18 = vpop.permute.xlu1 %629  ;;  %v512_v17 = vpop.permute.xlu2 %511  ;;  %v690_v51 = vmax.f32 %v674_v41, 0.0 }
 0x130   : > { %v660_v36 = vmul.f32 %v1330_v63, %v630_v18  ;;  %v557_v9 = vmul.f32 %v1323_v60, %v512_v17 }
 0x132   : > { %v676_v11 = vadd.f32 %v660_v36, %v578_v33  ;;  %v573_v1 = vadd.f32 %v557_v9, %v1316_v56  ;;  %v500_v56 = vpop.permute.xlu0 %499 }
 0x133   : > { %v554_v32 = vmul.f32 %v1323_v60, %v500_v56 }
 0x134   : > { %v692_v62 = vmax.f32 %v676_v11, 0.0 }
 0x135   : > { %v570_v31 = vadd.f32 %v554_v32, %v1306_v54 }
 0x136   : > { %708 = vmatpush.msra.mxu0 %v692_v62 }
 0x137   : > { %v626_v40 = vpop.permute.xlu1 %625 }
 0x138   : > { %v659_v42 = vmul.f32 %v1330_v63, %v626_v40  ;;  %v610_v30 = vpop.permute.xlu2 %609 }
 0x139   : > { %v655_v20 = vmul.f32 %v1330_v63, %v610_v30 }
 0x13a   : > { %v675_v43 = vadd.f32 %v659_v42, %v577_v26  ;;  %v594_v28 = vpop.permute.xlu0 %593 }
 0x13b   : > { %v671_v16 = vadd.f32 %v655_v20, %v573_v1  ;;  %v651_v36 = vmul.f32 %v1330_v63, %v594_v28 }
 0x13c   : > { %v691_v7 = vmax.f32 %v675_v43, 0.0 }
 0x13d   : > { %v687_v10 = vmax.f32 %v671_v16, 0.0 }
 0x13e   : > { %709 = vmatpush.msra.mxu0 %v691_v7 }
 0x140   : > { %v520_v27 = vpop.permute.xlu1 %519  ;;  %710 = vmatpush.msra.mxu0 %v690_v51  ;;  %v606_v57 = vpop.permute.xlu2 %605 }
 0x141   : > { %v559_v44 = vmul.f32 %v1323_v60, %v520_v27  ;;  %v654_v45 = vmul.f32 %v1330_v63, %v606_v57 }
 0x143   : > { %v575_v4 = vadd.f32 %v559_v44, %v477_v47 }
 0x149   : > { %v618_v53 = vpop.permute.xlu1 %617  ;;  %v496_v5 = vpop.permute.xlu2 %495 }
 0x14a   : > { %v657_v35 = vmul.f32 %v1330_v63, %v618_v53  ;;  %v553_v24 = vmul.f32 %v1323_v60, %v496_v5 }
 0x14c   : > { %v673_v0 = vadd.f32 %v657_v35, %v575_v4  ;;  %v569_v15 = vadd.f32 %v553_v24, %v1274_v29 }
 0x14e   : > { %v689_v61 = vmax.f32 %v673_v0, 0.0  ;;  %v667_v37 = vadd.f32 %v651_v36, %v569_v15 }
 0x150   : > { %711 = vmatpush.msra.mxu0 %v689_v61  ;;  %v683_v29 = vmax.f32 %v667_v37, 0.0 }
 0x151   : > { %v492_v19 = vpop.permute.xlu2 %491 }
 0x152   : > { %v508_v21 = vpop.permute.xlu1 %507  ;;  %712 = vmatpush.msra.mxu0 %v688_v52 }
 0x153   : > { %v556_v50 = vmul.f32 %v1323_v60, %v508_v21 }
 0x154   : > { %713 = vmatpush.msra.mxu0 %v687_v10 }
 0x155   : > { %v572_v3 = vadd.f32 %v556_v50, %v1301_v49 }
 0x157   : > { %v670_v13 = vadd.f32 %v654_v45, %v572_v3 }
 0x159   : > { %v686_v59 = vmax.f32 %v670_v13, 0.0 }
 0x15a   : > { %v504_v14 = vpop.permute.xlu1 %503  ;;  %v590_v33 = vpop.permute.xlu2 %589 }
 0x15b   : > { %714 = vmatpush.msra.mxu0 %v686_v59  ;;  %v555_v23 = vmul.f32 %v1323_v60, %v504_v14  ;;  %v650_v11 = vmul.f32 %v1330_v63, %v590_v33 }
 0x15d   : > { %v571_v6 = vadd.f32 %v555_v23, %v1283_v34  ;;  %v552_v34 = vmul.f32 %v1323_v60, %v492_v19 }
 0x15f   : > { %v568_v22 = vadd.f32 %v552_v34, %v1299_v48  ;;  %v697_v48 = vld [vmem:[%s1438_s2] sm:$0x3] }
 0x161   : > { %v666_v17 = vadd.f32 %v650_v11, %v568_v22 }
 0x163   : > { %v602_v58 = vpop.permute.xlu1 %601  ;;  %v682_v42 = vmax.f32 %v666_v17, 0.0 }
 0x164   : > { %v653_v46 = vmul.f32 %v1330_v63, %v602_v58 }
 0x166   : > { %v669_v49 = vadd.f32 %v653_v46, %v571_v6 }
 0x168   : > { %v685_v18 = vmax.f32 %v669_v49, 0.0  ;;  %v702_v27 = vpop.permute.xlu2 %701 }
 0x16a   : > { %715 = vmatpush.msra.mxu0 %v685_v18 }
 0x16b   : > { %v598_v12 = vpop.permute.xlu1 %597 }
 0x16c   : > { %v652_v55 = vmul.f32 %v1330_v63, %v598_v12 }
 0x16e   : > { %v668_v62 = vadd.f32 %v652_v55, %v570_v31 }
 0x170   : > { %v684_v38 = vmax.f32 %v668_v62, 0.0 }
 0x172   : > { %716 = vmatpush.msra.mxu0 %v684_v38 }
 0x174   : > { %v488_v40 = vpop.permute.xlu1 %487  ;;  %717 = vmatpush.msra.mxu0 %v683_v29 }
 0x175   : > { %v551_v26 = vmul.f32 %v1323_v60, %v488_v40 }
 0x176   : > { %718 = vmatpush.msra.mxu0 %v682_v42 }
 0x177   : > { %v567_v54 = vadd.f32 %v551_v26, %v1290_v39 }
 0x17d   : > { %v586_v43 = vpop.permute.xlu1 %585 }
 0x17e   : > { %v649_v41 = vmul.f32 %v1330_v63, %v586_v43 }
 0x180   : > { %v665_v7 = vadd.f32 %v649_v41, %v567_v54 }
 0x182   : > { %v681_v51 = vmax.f32 %v665_v7, 0.0 }
 0x184   : > { %719 = vmatpush.msra.mxu0 %v681_v51 }
 0x185   : > { %720 = vmatmul.f32.vlgmr.msra.gmra.mxu0 %v697_v48 }
 0x202   : > { %v721_v30 = vpop.f32.mrf.mxu0 }
 0x203   : > { %v722_v8 = vadd.f32 %v721_v30, %v702_v27 }
 0x205   : > { %v725_v2 = vsel %vm724_vm0, %v722_v8, -inf }
 0x206   : > { %v726_v60 = vrot.slane %v725_v2, 4 }
 0x208   : > { %v727_v44 = vmax.f32 %v725_v2, %v726_v60 }
 0x20a   : > { %v728_v47 = vrot.slane %v727_v44, 2 }
 0x20c   : > { %v729_v39 = vmax.f32 %v727_v44, %v728_v47 }
 0x20e   : > { %v730_v63 = vrot.slane %v729_v39, 1 }
 0x210   : > { %v731_v9 = vmax.f32 %v729_v39, %v730_v63 }
 0x212   : > { %v732_v53 = vsub.f32 %v722_v8, %v731_v9 }
 0x214   : > { %v733_v20 = vmul.f32 1.442695, %v732_v53 }
 0x216   : > { %911 = vpow2.f32 %v733_v20 }
 0x21c   : > { %v912_v4 = vpop.eup %911 }
 0x21d   : > { %v735_v35 = vsel %vm724_vm0, %v912_v4, 0.0 }
 0x21e   : > { %v736_v57 = vrot.slane %v735_v35, 4 }
 0x220   : > { %v737_v1 = vadd.f32 %v736_v57, %v735_v35 }
 0x222   : > { %v738_v0 = vrot.slane %v737_v1, 2 }
 0x224   : > { %v739_v61 = vadd.f32 %v738_v0, %v737_v1 }
 0x226   : > { %v740_v16 = vrot.slane %v739_v61, 1 }
 0x228   : > { %v741_v52 = vadd.f32 %v740_v16, %v739_v61 }
 0x22a   : > { %913 = vrcp.f32 %v741_v52 }
 0x230   : > { %v914_v21 = vpop.eup %913 }
 0x231   : > { %v743_v10 = vmul.f32 %v914_v21, %v912_v4 }
 0x233   : > { %744 = vst [vmem:[%s188_s14] sm:$0x3] %v743_v10 }
 0x234   : > { %942 = shalt.err (!%p939_p3)
}
 0x235   : > { %830 = dma.vmem_to_hbm [thread:$0]  (%p1047_p5), %s759_s20, 32, %s761_s22, %s746_s27  }
 0x236 PF: > { %p836_p4 = scmp.ge.s32.totalorder %s977_s18, 2  ;;  %s772_s7 = sand.u32 1, %s965_s15  }
 0x237   : > { %s773_s8 = scalar_lea.sflag [#allocation3], %s772_s7 }
 0x238   : > { %p833_p7 = pnand %p836_p4, %p1051_p6 }
 0x23a   : > { %p834_p8 = pneg %p833_p7 }
 0x23c   : > { %960 = dma.done.wait (%p834_p8), %s773_s8, 32  }
 0x23d   : > { %962 = vsyncadd (%p834_p8), %s773_s8, 4294967264  ;;  %p14_p9 = scmp.ge.s32.totalorder %s1034_s21, 4   ;;  %s1443_s15 = smov %s969_s16 }
 0x23e   : > { %s1444_s16 = smov %s973_s17  ;;  %s1445_s17 = smov %s1045_s24 }
 0x23f   : > { %s1446_s18 = smov %s1034_s21  ;;  %16 = sbr.rel (!%p14_p9) target bundleno = 3 (0x3), region = 71 }
 0x244   :  { %779 = vsyncpa [#allocation3], 1 }
 0x245   :  { %781 = vsyncpa [#allocation3 + $0x1], 1 }

</bundles_post_ra>
